<compile_context>
chip_gen: v5e
topology: v5e:2x2
jax: 0.10.0
libtpu: 0.0.40
codegen_flags: <defaults>
</compile_context>

<pallas_src>
import functools

import jax
import jax.numpy as jnp
from jax.experimental import pallas as pl
from jax.experimental.pallas import tpu as pltpu

_NEG_SLOPE = 0.2
_LN_EPS = 1e-6


def _round_up(a, m):
    return (a + m - 1) // m * m


# ---------------------------------------------------------------------------
# Fused kernel (depth / feature sizes baked in statically).
# ---------------------------------------------------------------------------
def _make_kernel(depth, hidden, embed):
    def kernel(x_ref, t_ref, c_ref,
               ce_w1, ce_b1, ce_w2, ce_b2,
               wcat, bcat, wo, bo,
               o_ref):
        f32 = jnp.float32
        bf16 = jnp.bfloat16

        def lrelu(v):
            return jnp.maximum(v, _NEG_SLOPE * v)

        def dot(a, b):  # bf16 MXU operands, f32 accumulation
            return jnp.dot(a.astype(bf16), b, preferred_element_type=f32)

        # ---- context-embed MLP (per-row) + precomputed t_emb rows ----------
        c = c_ref[...]
        h1 = lrelu(dot(c, ce_w1[...]) + ce_b1[...])
        c_emb = dot(h1, ce_w2[...]) + ce_b2[...]
        emb = c_emb + t_ref[...]                       # f32 (TM, embed)

        # ---- trunk: static unroll over depth --------------------------------
        x = x_ref[...]                                 # f32 (TM, hidden)
        inv_h = 1.0 / hidden
        for i in range(depth):
            # LayerNorm stats in f32; two independent cross-lane reductions.
            s1 = jnp.sum(x, axis=-1, keepdims=True)
            s2 = jnp.sum(x * x, axis=-1, keepdims=True)
            mean = s1 * inv_h
            var = jnp.maximum(s2 * inv_h - mean * mean, 0.0)
            h = lrelu((x - mean) * jax.lax.rsqrt(var + _LN_EPS))
            # One fused K = hidden+embed matmul: [h | emb] @ [W_i ; We_i],
            # biases already folded into bcat[i] = b_i + be_i.
            cat = jnp.concatenate([h, emb], axis=-1)   # (TM, hidden+embed)
            x = dot(cat, wcat[i]) + bcat[i]

        # ---- output head -----------------------------------------------------
        o_ref[...] = (dot(lrelu(x), wo[...]) + bo[...]).astype(o_ref.dtype)

    return kernel


# ---------------------------------------------------------------------------
# Forward-pass factory (static dims baked into the jitted wrapper).
# ---------------------------------------------------------------------------
def make_mlp_net_forward(noise_size, context_size, embed_dim, depth):
    K = noise_size + embed_dim   # fused trunk contraction dim

    @jax.jit
    def forward(q, x, timesteps, context):
        B, S, H = x.shape
        N = B * S

        # Row tile: ~6 grid steps (>= 3 per TC on v7x), multiple of 8, <= 512.
        # (On v5e/v6e with very large N a 1024 cap is also fine; 512 keeps
        #  double-buffered activation tiles trivially inside every VMEM budget.)
        TM = min(512, max(8, _round_up((N + 5) // 6, 8)))
        NP = _round_up(N, TM)

        # --- time-embed MLP on (B, E) in plain JAX (batch-only work),
        #     then broadcast over the seq axis into flat rows. ---
        t_emb = timestep_embedding(timesteps, embed_dim)
        t_emb = jnp.dot(t_emb, q["te_w1"]) + q["te_b1"]
        t_emb = jnp.maximum(t_emb, _NEG_SLOPE * t_emb)
        t_emb = jnp.dot(t_emb, q["te_w2"]) + q["te_b2"]                 # (B, E)
        t_rows = jnp.broadcast_to(t_emb[:, None, :], (B, S, embed_dim))
        t_rows = t_rows.reshape(N, embed_dim)

        x_rows = x.reshape(N, H).astype(jnp.float32)
        c_rows = context.reshape(N, context_size).astype(jnp.float32)

        if NP != N:  # small ragged tail only (< TM rows)
            pad = ((0, NP - N), (0, 0))
            x_rows = jnp.pad(x_rows, pad)
            t_rows = jnp.pad(t_rows, pad)
            c_rows = jnp.pad(c_rows, pad)

        def row(cols):
            return pl.BlockSpec((TM, cols), lambda i: (i, 0))

        def full(shape):
            z = (0,) * len(shape)
            return pl.BlockSpec(shape, lambda i, _z=z: _z)   # weights stay resident

        w_elems = (context_size * embed_dim + embed_dim * embed_dim
                   + depth * K * noise_size + noise_size * noise_size)
        flops = 2 * NP * (context_size * embed_dim + embed_dim * embed_dim
                          + depth * K * noise_size + noise_size * noise_size)
        bytes_accessed = (NP * (H + embed_dim + context_size + noise_size) * 4
                          + w_elems * 2
                          + (2 * embed_dim + depth * noise_size + noise_size) * 4)

        out = pl.pallas_call(
            _make_kernel(depth, noise_size, embed_dim),
            out_shape=jax.ShapeDtypeStruct((NP, noise_size), jnp.float32),
            grid=(NP // TM,),
            in_specs=[
                row(H), row(embed_dim), row(context_size),
                full((context_size, embed_dim)), full((1, embed_dim)),
                full((embed_dim, embed_dim)), full((1, embed_dim)),
                full((depth, K, noise_size)), full((depth, 1, noise_size)),
                full((noise_size, noise_size)), full((1, noise_size)),
            ],
            out_specs=row(noise_size),
            compiler_params=pltpu.CompilerParams(
                dimension_semantics=("parallel",)),   # row tiles shard over v7x's 2 TCs
            cost_estimate=pl.CostEstimate(
                flops=int(flops),
                transcendentals=int(NP * depth),
                bytes_accessed=int(bytes_accessed)),
        )(x_rows, t_rows, c_rows,
          q["ce_w1"], q["ce_b1"], q["ce_w2"], q["ce_b2"],
          q["Wcat"], q["bcat"], q["Wo"], q["bo"])

        return out[:N].reshape(B, S, noise_size)

    return forward


# ---------------------------------------------------------------------------
# Plain-JAX glue: sinusoidal timestep embedding (repeat_only=False).
# ---------------------------------------------------------------------------
def timestep_embedding(timesteps, dim, max_period=10000.0):
    half = dim // 2
    freqs = jnp.exp(-jnp.log(max_period) * jnp.arange(half, dtype=jnp.float32) / half)
    args = timesteps.astype(jnp.float32)[:, None] * freqs[None, :]
    emb = jnp.concatenate([jnp.cos(args), jnp.sin(args)], axis=-1)
    if dim % 2:
        emb = jnp.concatenate([emb, jnp.zeros_like(emb[:, :1])], axis=-1)
    return emb


# ---------------------------------------------------------------------------
# Parameters: true (torch-layout transposed to (in, out)) params + host-side
# packing into the fused bf16 layout the kernel consumes.
# ---------------------------------------------------------------------------
def init_params(key, noise_size, context_size, embed_dim, depth):
    hidden = noise_size
    ks = jax.random.split(key, 8)

    def lin(k, fin, fout):
        kw, kb = jax.random.split(k)
        s = 1.0 / jnp.sqrt(fin)
        return (s * jax.random.normal(kw, (fin, fout), jnp.float32),
                s * jax.random.normal(kb, (1, fout), jnp.float32))

    p = {}
    p["te_w1"], p["te_b1"] = lin(ks[0], embed_dim, embed_dim)
    p["te_w2"], p["te_b2"] = lin(ks[1], embed_dim, embed_dim)
    p["ce_w1"], p["ce_b1"] = lin(ks[2], context_size, embed_dim)
    p["ce_w2"], p["ce_b2"] = lin(ks[3], embed_dim, embed_dim)
    Wl, bl, Wel, bel = [], [], [], []
    wk = jax.random.split(ks[4], depth)
    ek = jax.random.split(ks[5], depth)
    for i in range(depth):
        w, b = lin(wk[i], hidden, hidden); Wl.append(w); bl.append(b)
        we, be = lin(ek[i], embed_dim, hidden); Wel.append(we); bel.append(be)
    p["W"], p["b"] = jnp.stack(Wl), jnp.stack(bl)
    p["We"], p["be"] = jnp.stack(Wel), jnp.stack(bel)
    p["Wo"], p["bo"] = lin(ks[6], hidden, noise_size)
    return p


def pack_params(p):
    bf16 = jnp.bfloat16
    q = {
        # time-embed MLP runs in plain JAX on (B, E): keep f32.
        "te_w1": p["te_w1"], "te_b1": p["te_b1"],
        "te_w2": p["te_w2"], "te_b2": p["te_b2"],
        # in-kernel MXU operands: bf16 weights, f32 biases.
        "ce_w1": p["ce_w1"].astype(bf16), "ce_b1": p["ce_b1"],
        "ce_w2": p["ce_w2"].astype(bf16), "ce_b2": p["ce_b2"],
        "Wo": p["Wo"].astype(bf16), "bo": p["bo"],
        # co-packed trunk weights: K = hidden + embed (single 128-lane K block
        # whenever hidden + embed <= 128); biases folded once.
        "Wcat": jnp.concatenate([p["W"], p["We"]], axis=1).astype(bf16),
        "bcat": p["b"] + p["be"],
    }
    return q


# ---------------------------------------------------------------------------
# Pure-JAX reference (mirrors torch MLPNet.forward) for a correctness check.
# ---------------------------------------------------------------------------
def mlp_net_reference(p, x, timesteps, context, embed_dim, depth):
    dot = functools.partial(jnp.dot, precision=jax.lax.Precision.HIGHEST)

    def lrelu(v):
        return jnp.maximum(v, _NEG_SLOPE * v)

    t_emb = timestep_embedding(timesteps, embed_dim)
    t_emb = dot(t_emb, p["te_w1"]) + p["te_b1"]
    t_emb = dot(lrelu(t_emb), p["te_w2"]) + p["te_b2"]
    t_emb = t_emb[:, None, :]                                    # (B,1,E)
    c_emb = dot(context, p["ce_w1"]) + p["ce_b1"]
    c_emb = dot(lrelu(c_emb), p["ce_w2"]) + p["ce_b2"]           # (B,S,E)
    emb = t_emb + c_emb
    h = x
    for i in range(depth):
        mean = jnp.mean(h, axis=-1, keepdims=True)
        var = jnp.mean((h - mean) ** 2, axis=-1, keepdims=True)
        hn = lrelu((h - mean) * jax.lax.rsqrt(var + _LN_EPS))
        h = dot(hn, p["W"][i]) + p["b"][i]
        h = h + dot(emb, p["We"][i]) + p["be"][i]
    return dot(lrelu(h), p["Wo"]) + p["bo"]


if __name__ == "__main__":
    noise_size = 32      # == hidden_size
    context_size = 16
    embed_dim = 32
    depth = 2
    B, S = 2, 8

    key = jax.random.PRNGKey(0)
    kp, kx, kt, kc = jax.random.split(key, 4)

    params = init_params(kp, noise_size, context_size, embed_dim, depth)
    packed = pack_params(params)

    x = jax.random.normal(kx, (B, S, noise_size), jnp.float32)
    timesteps = jax.random.uniform(kt, (B,), jnp.float32, 0.0, 1000.0)
    context = jax.random.normal(kc, (B, S, context_size), jnp.float32)

    forward = make_mlp_net_forward(noise_size, context_size, embed_dim, depth)
    out = forward(packed, x, timesteps, context)
    jax.block_until_ready(out)
    assert out.shape == (B, S, noise_size), out.shape

    ref = mlp_net_reference(params, x, timesteps, context, embed_dim, depth)
    max_err = float(jnp.max(jnp.abs(out - ref)))
    # bf16 MXU operands: slightly looser tolerance than the pure-f32 version.
    assert max_err < 5e-2, f"max abs err {max_err}"

    print("KERNEL_OK")
</pallas_src>

<mosaic_0001>
module attributes {stable_mosaic.version = 11 : i64} {
  func.func @kernel(%arg0: i32, %arg1: memref<8x32xf32, #tpu.memory_space<vmem>>, %arg2: memref<8x32xf32, #tpu.memory_space<vmem>>, %arg3: memref<8x16xf32, #tpu.memory_space<vmem>>, %arg4: memref<16x32xbf16, #tpu.memory_space<vmem>>, %arg5: memref<1x32xf32, #tpu.memory_space<vmem>>, %arg6: memref<32x32xbf16, #tpu.memory_space<vmem>>, %arg7: memref<1x32xf32, #tpu.memory_space<vmem>>, %arg8: memref<2x64x32xbf16, #tpu.memory_space<vmem>>, %arg9: memref<2x1x32xf32, #tpu.memory_space<vmem>>, %arg10: memref<32x32xbf16, #tpu.memory_space<vmem>>, %arg11: memref<1x32xf32, #tpu.memory_space<vmem>>, %arg12: memref<8x32xf32, #tpu.memory_space<vmem>>) attributes {dimension_semantics = [#tpu.dimension_semantics<parallel>], iteration_bounds = array<i64: 2>, scalar_prefetch = 0 : i64, scratch_operands = 0 : i64, tpu.core_type = #tpu.core_type<tc>, window_params = [{transform_indices = @transform_0, window_bounds = array<i64: 8, 32>}, {transform_indices = @transform_1, window_bounds = array<i64: 8, 32>}, {transform_indices = @transform_2, window_bounds = array<i64: 8, 16>}, {pipeline_mode = #tpu.pipeline_mode<synchronous>, transform_indices = @transform_3, window_bounds = array<i64: 16, 32>}, {pipeline_mode = #tpu.pipeline_mode<synchronous>, transform_indices = @transform_4, window_bounds = array<i64: 1, 32>}, {pipeline_mode = #tpu.pipeline_mode<synchronous>, transform_indices = @transform_5, window_bounds = array<i64: 32, 32>}, {pipeline_mode = #tpu.pipeline_mode<synchronous>, transform_indices = @transform_6, window_bounds = array<i64: 1, 32>}, {pipeline_mode = #tpu.pipeline_mode<synchronous>, transform_indices = @transform_7, window_bounds = array<i64: 2, 64, 32>}, {pipeline_mode = #tpu.pipeline_mode<synchronous>, transform_indices = @transform_8, window_bounds = array<i64: 2, 1, 32>}, {pipeline_mode = #tpu.pipeline_mode<synchronous>, transform_indices = @transform_9, window_bounds = array<i64: 32, 32>}, {pipeline_mode = #tpu.pipeline_mode<synchronous>, transform_indices = @transform_10, window_bounds = array<i64: 1, 32>}, {transform_indices = @transform_11, window_bounds = array<i64: 8, 32>}]} {
    %c0 = arith.constant 0 : index
    %c0_0 = arith.constant 0 : index
    %0 = vector.load %arg3[%c0, %c0_0] : memref<8x16xf32, #tpu.memory_space<vmem>>, vector<8x16xf32>
    %c0_1 = arith.constant 0 : index
    %c0_2 = arith.constant 0 : index
    %1 = vector.load %arg4[%c0_1, %c0_2] : memref<16x32xbf16, #tpu.memory_space<vmem>>, vector<16x32xbf16>
    %2 = arith.truncf %0 : vector<8x16xf32> to vector<8x16xbf16>
    %cst = arith.constant dense<0.000000e+00> : vector<8x32xf32>
    %3 = tpu.matmul %2, %1, %cst {dimension_numbers = #tpu.dot_dimension_numbers<[1], [0], [0], [1], [0, 0, 1, 1], [], []>} : vector<8x16xbf16>, vector<16x32xbf16>, vector<8x32xf32> -> vector<8x32xf32>
    %c0_3 = arith.constant 0 : index
    %c0_4 = arith.constant 0 : index
    %4 = vector.load %arg5[%c0_3, %c0_4] : memref<1x32xf32, #tpu.memory_space<vmem>>, vector<1x32xf32>
    %5 = vector.broadcast %4 : vector<1x32xf32> to vector<8x32xf32>
    %6 = arith.addf %3, %5 : vector<8x32xf32>
    %cst_5 = arith.constant 2.000000e-01 : f32
    %7 = vector.broadcast %cst_5 : f32 to vector<8x32xf32>
    %8 = arith.mulf %7, %6 : vector<8x32xf32>
    %9 = arith.maximumf %6, %8 : vector<8x32xf32>
    %c0_6 = arith.constant 0 : index
    %c0_7 = arith.constant 0 : index
    %10 = vector.load %arg6[%c0_6, %c0_7] : memref<32x32xbf16, #tpu.memory_space<vmem>>, vector<32x32xbf16>
    %11 = arith.truncf %9 : vector<8x32xf32> to vector<8x32xbf16>
    %cst_8 = arith.constant dense<0.000000e+00> : vector<8x32xf32>
    %12 = tpu.matmul %11, %10, %cst_8 {dimension_numbers = #tpu.dot_dimension_numbers<[1], [0], [0], [1], [0, 0, 1, 1], [], []>} : vector<8x32xbf16>, vector<32x32xbf16>, vector<8x32xf32> -> vector<8x32xf32>
    %c0_9 = arith.constant 0 : index
    %c0_10 = arith.constant 0 : index
    %13 = vector.load %arg7[%c0_9, %c0_10] : memref<1x32xf32, #tpu.memory_space<vmem>>, vector<1x32xf32>
    %14 = vector.broadcast %13 : vector<1x32xf32> to vector<8x32xf32>
    %15 = arith.addf %12, %14 : vector<8x32xf32>
    %c0_11 = arith.constant 0 : index
    %c0_12 = arith.constant 0 : index
    %16 = vector.load %arg2[%c0_11, %c0_12] : memref<8x32xf32, #tpu.memory_space<vmem>>, vector<8x32xf32>
    %17 = arith.addf %15, %16 : vector<8x32xf32>
    %c0_13 = arith.constant 0 : index
    %c0_14 = arith.constant 0 : index
    %18 = vector.load %arg1[%c0_13, %c0_14] : memref<8x32xf32, #tpu.memory_space<vmem>>, vector<8x32xf32>
    %cst_15 = arith.constant dense<0.000000e+00> : vector<8xf32>
    %19 = vector.multi_reduction <add>, %18, %cst_15 [1] : vector<8x32xf32> to vector<8xf32>
    %20 = vector.shape_cast %19 : vector<8xf32> to vector<8x1xf32>
    %21 = arith.mulf %18, %18 : vector<8x32xf32>
    %cst_16 = arith.constant dense<0.000000e+00> : vector<8xf32>
    %22 = vector.multi_reduction <add>, %21, %cst_16 [1] : vector<8x32xf32> to vector<8xf32>
    %23 = vector.shape_cast %22 : vector<8xf32> to vector<8x1xf32>
    %cst_17 = arith.constant 3.125000e-02 : f32
    %24 = vector.broadcast %cst_17 : f32 to vector<8x1xf32>
    %25 = arith.mulf %20, %24 : vector<8x1xf32>
    %cst_18 = arith.constant 3.125000e-02 : f32
    %26 = vector.broadcast %cst_18 : f32 to vector<8x1xf32>
    %27 = arith.mulf %23, %26 : vector<8x1xf32>
    %28 = arith.mulf %25, %25 : vector<8x1xf32>
    %29 = arith.subf %27, %28 : vector<8x1xf32>
    %cst_19 = arith.constant 0.000000e+00 : f32
    %30 = vector.broadcast %cst_19 : f32 to vector<8x1xf32>
    %31 = arith.maximumf %29, %30 : vector<8x1xf32>
    %32 = vector.broadcast %25 : vector<8x1xf32> to vector<8x32xf32>
    %33 = arith.subf %18, %32 : vector<8x32xf32>
    %cst_20 = arith.constant 9.99999997E-7 : f32
    %34 = vector.broadcast %cst_20 : f32 to vector<8x1xf32>
    %35 = arith.addf %31, %34 : vector<8x1xf32>
    %36 = math.rsqrt %35 : vector<8x1xf32>
    %37 = vector.broadcast %36 : vector<8x1xf32> to vector<8x32xf32>
    %38 = arith.mulf %33, %37 : vector<8x32xf32>
    %cst_21 = arith.constant 2.000000e-01 : f32
    %39 = vector.broadcast %cst_21 : f32 to vector<8x32xf32>
    %40 = arith.mulf %39, %38 : vector<8x32xf32>
    %41 = arith.maximumf %38, %40 : vector<8x32xf32>
    %42 = tpu.concatenate %41, %17 in 1 : vector<8x32xf32>, vector<8x32xf32> -> vector<8x64xf32>
    %c0_22 = arith.constant 0 : index
    %c0_23 = arith.constant 0 : index
    %c0_24 = arith.constant 0 : index
    %43 = vector.load %arg8[%c0_22, %c0_23, %c0_24] : memref<2x64x32xbf16, #tpu.memory_space<vmem>>, vector<1x64x32xbf16>
    %44 = vector.shape_cast %43 : vector<1x64x32xbf16> to vector<64x32xbf16>
    %45 = arith.truncf %42 : vector<8x64xf32> to vector<8x64xbf16>
    %cst_25 = arith.constant dense<0.000000e+00> : vector<8x32xf32>
    %46 = tpu.matmul %45, %44, %cst_25 {dimension_numbers = #tpu.dot_dimension_numbers<[1], [0], [0], [1], [0, 0, 1, 1], [], []>} : vector<8x64xbf16>, vector<64x32xbf16>, vector<8x32xf32> -> vector<8x32xf32>
    %c0_26 = arith.constant 0 : index
    %c0_27 = arith.constant 0 : index
    %c0_28 = arith.constant 0 : index
    %47 = vector.load %arg9[%c0_26, %c0_27, %c0_28] : memref<2x1x32xf32, #tpu.memory_space<vmem>>, vector<1x1x32xf32>
    %48 = vector.shape_cast %47 : vector<1x1x32xf32> to vector<1x32xf32>
    %49 = vector.broadcast %48 : vector<1x32xf32> to vector<8x32xf32>
    %50 = arith.addf %46, %49 : vector<8x32xf32>
    %cst_29 = arith.constant dense<0.000000e+00> : vector<8xf32>
    %51 = vector.multi_reduction <add>, %50, %cst_29 [1] : vector<8x32xf32> to vector<8xf32>
    %52 = vector.shape_cast %51 : vector<8xf32> to vector<8x1xf32>
    %53 = arith.mulf %50, %50 : vector<8x32xf32>
    %cst_30 = arith.constant dense<0.000000e+00> : vector<8xf32>
    %54 = vector.multi_reduction <add>, %53, %cst_30 [1] : vector<8x32xf32> to vector<8xf32>
    %55 = vector.shape_cast %54 : vector<8xf32> to vector<8x1xf32>
    %cst_31 = arith.constant 3.125000e-02 : f32
    %56 = vector.broadcast %cst_31 : f32 to vector<8x1xf32>
    %57 = arith.mulf %52, %56 : vector<8x1xf32>
    %cst_32 = arith.constant 3.125000e-02 : f32
    %58 = vector.broadcast %cst_32 : f32 to vector<8x1xf32>
    %59 = arith.mulf %55, %58 : vector<8x1xf32>
    %60 = arith.mulf %57, %57 : vector<8x1xf32>
    %61 = arith.subf %59, %60 : vector<8x1xf32>
    %cst_33 = arith.constant 0.000000e+00 : f32
    %62 = vector.broadcast %cst_33 : f32 to vector<8x1xf32>
    %63 = arith.maximumf %61, %62 : vector<8x1xf32>
    %64 = vector.broadcast %57 : vector<8x1xf32> to vector<8x32xf32>
    %65 = arith.subf %50, %64 : vector<8x32xf32>
    %cst_34 = arith.constant 9.99999997E-7 : f32
    %66 = vector.broadcast %cst_34 : f32 to vector<8x1xf32>
    %67 = arith.addf %63, %66 : vector<8x1xf32>
    %68 = math.rsqrt %67 : vector<8x1xf32>
    %69 = vector.broadcast %68 : vector<8x1xf32> to vector<8x32xf32>
    %70 = arith.mulf %65, %69 : vector<8x32xf32>
    %cst_35 = arith.constant 2.000000e-01 : f32
    %71 = vector.broadcast %cst_35 : f32 to vector<8x32xf32>
    %72 = arith.mulf %71, %70 : vector<8x32xf32>
    %73 = arith.maximumf %70, %72 : vector<8x32xf32>
    %74 = tpu.concatenate %73, %17 in 1 : vector<8x32xf32>, vector<8x32xf32> -> vector<8x64xf32>
    %c1 = arith.constant 1 : index
    %c0_36 = arith.constant 0 : index
    %c0_37 = arith.constant 0 : index
    %75 = vector.load %arg8[%c1, %c0_36, %c0_37] : memref<2x64x32xbf16, #tpu.memory_space<vmem>>, vector<1x64x32xbf16>
    %76 = vector.shape_cast %75 : vector<1x64x32xbf16> to vector<64x32xbf16>
    %77 = arith.truncf %74 : vector<8x64xf32> to vector<8x64xbf16>
    %cst_38 = arith.constant dense<0.000000e+00> : vector<8x32xf32>
    %78 = tpu.matmul %77, %76, %cst_38 {dimension_numbers = #tpu.dot_dimension_numbers<[1], [0], [0], [1], [0, 0, 1, 1], [], []>} : vector<8x64xbf16>, vector<64x32xbf16>, vector<8x32xf32> -> vector<8x32xf32>
    %c1_39 = arith.constant 1 : index
    %c0_40 = arith.constant 0 : index
    %c0_41 = arith.constant 0 : index
    %79 = vector.load %arg9[%c1_39, %c0_40, %c0_41] : memref<2x1x32xf32, #tpu.memory_space<vmem>>, vector<1x1x32xf32>
    %80 = vector.shape_cast %79 : vector<1x1x32xf32> to vector<1x32xf32>
    %81 = vector.broadcast %80 : vector<1x32xf32> to vector<8x32xf32>
    %82 = arith.addf %78, %81 : vector<8x32xf32>
    %cst_42 = arith.constant 2.000000e-01 : f32
    %83 = vector.broadcast %cst_42 : f32 to vector<8x32xf32>
    %84 = arith.mulf %83, %82 : vector<8x32xf32>
    %85 = arith.maximumf %82, %84 : vector<8x32xf32>
    %c0_43 = arith.constant 0 : index
    %c0_44 = arith.constant 0 : index
    %86 = vector.load %arg10[%c0_43, %c0_44] : memref<32x32xbf16, #tpu.memory_space<vmem>>, vector<32x32xbf16>
    %87 = arith.truncf %85 : vector<8x32xf32> to vector<8x32xbf16>
    %cst_45 = arith.constant dense<0.000000e+00> : vector<8x32xf32>
    %88 = tpu.matmul %87, %86, %cst_45 {dimension_numbers = #tpu.dot_dimension_numbers<[1], [0], [0], [1], [0, 0, 1, 1], [], []>} : vector<8x32xbf16>, vector<32x32xbf16>, vector<8x32xf32> -> vector<8x32xf32>
    %c0_46 = arith.constant 0 : index
    %c0_47 = arith.constant 0 : index
    %89 = vector.load %arg11[%c0_46, %c0_47] : memref<1x32xf32, #tpu.memory_space<vmem>>, vector<1x32xf32>
    %90 = vector.broadcast %89 : vector<1x32xf32> to vector<8x32xf32>
    %91 = arith.addf %88, %90 : vector<8x32xf32>
    %c0_48 = arith.constant 0 : index
    %c0_49 = arith.constant 0 : index
    %92 = vector.load %arg12[%c0_48, %c0_49] : memref<8x32xf32, #tpu.memory_space<vmem>>, vector<8x32xf32>
    tpu.vector_store %arg12[%c0_48, %c0_49], %91 {strides = array<i32>} : memref<8x32xf32, #tpu.memory_space<vmem>>, vector<8x32xf32>,
    return
  }
  func.func @transform_0(%arg0: i32) -> (i32, i32) {
    %c0_i32 = arith.constant 0 : i32
    %c0_i32_0 = arith.constant 0 : i32
    return %arg0, %c0_i32 : i32, i32
  }
  func.func @transform_1(%arg0: i32) -> (i32, i32) {
    %c0_i32 = arith.constant 0 : i32
    %c0_i32_0 = arith.constant 0 : i32
    return %arg0, %c0_i32 : i32, i32
  }
  func.func @transform_2(%arg0: i32) -> (i32, i32) {
    %c0_i32 = arith.constant 0 : i32
    %c0_i32_0 = arith.constant 0 : i32
    return %arg0, %c0_i32 : i32, i32
  }
  func.func @transform_3(%arg0: i32) -> (i32, i32) {
    %c0_i32 = arith.constant 0 : i32
    %c0_i32_0 = arith.constant 0 : i32
    %c0_i32_1 = arith.constant 0 : i32
    return %c0_i32, %c0_i32_0 : i32, i32
  }
  func.func @transform_4(%arg0: i32) -> (i32, i32) {
    %c0_i32 = arith.constant 0 : i32
    %c0_i32_0 = arith.constant 0 : i32
    %c0_i32_1 = arith.constant 0 : i32
    return %c0_i32, %c0_i32_0 : i32, i32
  }
  func.func @transform_5(%arg0: i32) -> (i32, i32) {
    %c0_i32 = arith.constant 0 : i32
    %c0_i32_0 = arith.constant 0 : i32
    %c0_i32_1 = arith.constant 0 : i32
    return %c0_i32, %c0_i32_0 : i32, i32
  }
  func.func @transform_6(%arg0: i32) -> (i32, i32) {
    %c0_i32 = arith.constant 0 : i32
    %c0_i32_0 = arith.constant 0 : i32
    %c0_i32_1 = arith.constant 0 : i32
    return %c0_i32, %c0_i32_0 : i32, i32
  }
  func.func @transform_7(%arg0: i32) -> (i32, i32, i32) {
    %c0_i32 = arith.constant 0 : i32
    %c0_i32_0 = arith.constant 0 : i32
    %c0_i32_1 = arith.constant 0 : i32
    %c0_i32_2 = arith.constant 0 : i32
    return %c0_i32, %c0_i32_0, %c0_i32_1 : i32, i32, i32
  }
  func.func @transform_8(%arg0: i32) -> (i32, i32, i32) {
    %c0_i32 = arith.constant 0 : i32
    %c0_i32_0 = arith.constant 0 : i32
    %c0_i32_1 = arith.constant 0 : i32
    %c0_i32_2 = arith.constant 0 : i32
    return %c0_i32, %c0_i32_0, %c0_i32_1 : i32, i32, i32
  }
  func.func @transform_9(%arg0: i32) -> (i32, i32) {
    %c0_i32 = arith.constant 0 : i32
    %c0_i32_0 = arith.constant 0 : i32
    %c0_i32_1 = arith.constant 0 : i32
    return %c0_i32, %c0_i32_0 : i32, i32
  }
  func.func @transform_10(%arg0: i32) -> (i32, i32) {
    %c0_i32 = arith.constant 0 : i32
    %c0_i32_0 = arith.constant 0 : i32
    %c0_i32_1 = arith.constant 0 : i32
    return %c0_i32, %c0_i32_0 : i32, i32
  }
  func.func @transform_11(%arg0: i32) -> (i32, i32) {
    %c0_i32 = arith.constant 0 : i32
    %c0_i32_0 = arith.constant 0 : i32
    return %arg0, %c0_i32 : i32, i32
  }
}

</mosaic_0001>

<bundles_post_ra>
// kernel: forward.1
= control target key start
LH: loop header
LB: loop body
LE: loop exit
PB: predicated region body
PF: predicated region fallthrough
CT: control target
= control target key end

     0   :  { %s1225_s0 = inlined_call_operand.vmem [shape: f32[16,32], index: 0, kind: input, shape index: {}]   ;;  %s1226_s1 = inlined_call_operand.vmem [shape: f32[16,32], index: 1, kind: input, shape index: {}]   ;;  %s1227_s2 = inlined_call_operand.vmem [shape: f32[16,16], index: 2, kind: input, shape index: {}]   ;;  %s1228_s3 = inlined_call_operand.vmem [shape: bf16[16,32], index: 3, kind: input, shape index: {}]   ;;  %s1229_s4 = inlined_call_operand.vmem [shape: f32[1,32], index: 4, kind: input, shape index: {}]   ;;  %s1230_s5 = inlined_call_operand.vmem [shape: bf16[32,32], index: 5, kind: input, shape index: {}]   ;;  %s1231_s6 = inlined_call_operand.vmem [shape: f32[1,32], index: 6, kind: input, shape index: {}]   ;;  %s1232_s7 = inlined_call_operand.vmem [shape: bf16[2,64,32], index: 7, kind: input, shape index: {}]   ;;  %s1233_s8 = inlined_call_operand.vmem [shape: f32[2,1,32], index: 8, kind: input, shape index: {}]   ;;  %s1234_s9 = inlined_call_operand.vmem [shape: bf16[32,32], index: 9, kind: input, shape index: {}]   ;;  %s1235_s10 = inlined_call_operand.vmem [shape: f32[1,32], index: 10, kind: input, shape index: {}]   ;;  %s1236_s11 = inlined_call_operand.hbm [shape: f32[16,32], index: 11, kind: output, shape index: {}]  }
   0x1   :  { %1237 = sst [smem:[#allocation5_spill]] %s1225_s0 }
   0x2   :  { %1238 = sst [smem:[#allocation6_spill]] %s1226_s1 }
   0x3   :  { %1239 = sst [smem:[#allocation7_spill]] %s1227_s2 }
   0x4   :  { %16 = vsyncpa [#allocation3], 0 }
   0x5   :  { %18 = vsyncpa [#allocation3 + $0x1], 0  ;;  %s1064_s17 = smov 0   ;;  %s1066_s18 = smov 0  }
   0x6   :  { %s1068_s19 = smov 0   ;;  %s1070_s20 = smov 0  }
   0x7 LB: > { %s1085_s21 = sadd.s32 4294967295, %s1001_s20   ;;  %s799_s22 = sadd.s32 4294967294, %s1001_s20   ;;  %s1001_s20 = sphi %s1070_s20, %s1248_s20   ;;  %s997_s19 = sphi %s1068_s19, %s1247_s19   ;;  %s993_s18 = sphi %s1066_s18, %s1246_s18   ;;  %s989_s17 = sphi %s1064_s17, %s1245_s17  }
   0x8   : > { %s1089_s23 = sadd.s32 1, %s1001_s20   ;;  %s277_s24 = sadd.s32 1, %s997_s19 }
   0x9   : > { %s274_s25 = ssub.s32 %s1001_s20, %s1089_s23  ;;  %p287_p0 = scmp.ne.s32.totalorder %s997_s19, %s993_s18 }
   0xa   : > { %p275_p1 = scmp.eq.s32.totalorder %s274_s25, 0  ;;  %p288_p2 = scmp.eq.s32.totalorder %s1085_s21, 1 }
   0xb   : > { %p293_p3 = scmp.ne.s32.totalorder %s993_s18, %s989_s17  ;;  %p294_p4 = scmp.eq.s32.totalorder %s799_s22, 1 }
   0xc   : > { %s1100_s26 = scalar_select %p275_p1, %s997_s19, %s277_s24  }
   0xd   : > { %p1102_p5 = por %p288_p2, %p287_p0  ;;  %p1106_p6 = por %p294_p4, %p293_p3 }
   0xe   : > { %p802_p7 = scmp.ge.s32.totalorder %s1001_s20, 1  ;;  %p357_p8 = scmp.lt.s32.totalorder %s1001_s20, 3 }
  0x10   : > { %p358_p9 = pnand %p802_p7, %p357_p8 }
  0x11   : > { %p404_p10 = scmp.lt.s32.totalorder (!%p358_p9), %s1085_s21, 1  ;;  %s1242_s2 = sld [smem:[#allocation7_spill]] (!%p358_p9) }
  0x12   : > { %361 = sbr.rel (%p358_p9) target bundleno = 974 (0x3ce), region = 64  ;;  %s1243_s0 = sld [smem:[#allocation5_spill]] (!%p358_p9) }
  0x13   : > { %s1244_s1 = sld [smem:[#allocation6_spill]] (!%p358_p9)  ;;  %s1003_s24 = smov (!%p358_p9), 32  }
  0x14   : > { %s401_s15 = sand.u32 (!%p358_p9), 1, %s993_s18  }
  0x17   : > { %v877_v0 = vld [vmem:[%s1228_s3] sm:$0xff]  ;;  %s405_s12 = scalar_select %p404_p10, %s1085_s21, 1  ;;  %vm431_vm0 = vcmask 130048   ;;  %v879_v3 = vld [vmem:[%s1230_s5 + $0x8] sm:$0xff]  ;;  %vm471_vm1 = vcmask 261120   ;;  %v883_v16 = vld [vmem:[%s1232_s7 + $0x18] sm:$0xff] }
  0x18   : > { %442 = vmatpush.bf16.msra.mxu0 %v877_v0  ;;  %481 = vmatpush.bf16.msra.mxu1 %v879_v3  ;;  %v878_v4 = vld [vmem:[%s1230_s5] sm:$0xff]  ;;  %v882_v17 = vld [vmem:[%s1232_s7 + $0x10] sm:$0xff]  ;;  %v881_v18 = vld [vmem:[%s1232_s7 + $0x8] sm:$0xff]  ;;  %vm560_vm5 = vcmask 523264  }
  0x19   : > { %s1117_s13 = sshll.u32 %s405_s12, 3  ;;  %v930_v9 = vld [vmem:[%s1229_s4] ss:$0 sm:$0xff]  ;;  %568 = vmatpush.bf16.msra.mxu2 %v883_v16  ;;  %v887_v55 = vld [vmem:[%s1232_s7 + $0x38] sm:$0xff]  ;;  %v886_v56 = vld [vmem:[%s1232_s7 + $0x30] sm:$0xff] }
  0x1a   : > { %s415_s16 = scalar_lea.vmem %s1242_s2, %s1117_s13  ;;  %s407_s14 = scalar_lea.vmem %s1243_s0, %s1117_s13  ;;  %v931_v19 = vld [vmem:[%s1231_s6] ss:$0 sm:$0xff]  ;;  %651 = vmatpush.bf16.msra.mxu3 %v887_v55  ;;  %v885_v57 = vld [vmem:[%s1232_s7 + $0x28] sm:$0xff] }
  0x1b   : > { %v417_v1 = vld [vmem:[%s415_s16] sm:$0xff]  ;;  %s411_s22 = scalar_lea.vmem %s1244_s1, %s1117_s13  ;;  %s874_s16 = sshll.u32 %s1085_s21, 3 }
  0x1c   : > { %v420_v2 = vpack.c.bf16 %v417_v1, %v417_v1  ;;  %482 = vmatpush.bf16.msra.mxu1 %v878_v4  ;;  %v490_v5 = vld [vmem:[%s407_s14] sm:$0xff]  ;;  %v889_v1 = vld [vmem:[%s1234_s9 + $0x8] sm:$0xff]  ;;  %s711_s0 = scalar_lea.hbm %s1236_s11, %s874_s16  ;;  %s701_s21 = scalar_lea.sflag [#allocation3], %s401_s15 }
  0x1d   : > { %v491_v6 = vsel %vm471_vm1, %v490_v5, 0.0  ;;  %v494_v7 = vmul.f32 %v490_v5, %v490_v5  ;;  %569 = vmatpush.bf16.msra.mxu2 %v882_v17  ;;  %v488_v21 = vld [vmem:[%s411_s22] sm:$0xff]  ;;  %692 = vmatpush.bf16.msrb.mxu0 %v889_v1  ;;  %s803_s22 = sshll.u32 %s401_s15, 3  ;;  %s715_s14 = sshll.u32 %s711_s0, 4  ;;  %s716_s14 = int_to_ptr.hbm [resolvable:$true] %s715_s14 }
  0x1e   : > { %811 = vmatmul.msk.bf16.vlgmr.msra.gmra.mxu0 %vm431_vm0, %v420_v2  ;;  %492 = vadd.xlane.f32.xlu0 %v491_v6  ;;  %v880_v34 = vld [vmem:[%s1232_s7] sm:$0xff]  ;;  %s403_s30 = scalar_lea.vmem [#allocation2], %s803_s22  ;;  %s953_s1 = sshra.s32 %s716_s14, 4  ;;  %s954_s1 = int_to_ptr.hbm [resolvable:$true] %s953_s1 }
  0x1f   : > { %v495_v8 = vsel %vm471_vm1, %v494_v7, 0.0  ;;  %v932_v48 = vld [vmem:[%s1233_s8] ss:$0 sm:$0xff]  ;;  %652 = vmatpush.bf16.msra.mxu3 %v886_v56  ;;  %s713_s12 = sshll.u32 %s403_s30, 4  ;;  %s955_s2 = scalar_lea.hbm %s954_s1, 8  ;;  %s714_s12 = int_to_ptr.vmem [resolvable:$true] %s713_s12 }
  0x20   : > { %v884_v58 = vld [vmem:[%s1232_s7 + $0x20] sm:$0xff]  ;;  %p956_p11 = scmp.ne.s32.totalorder %s954_s1, %s955_s2  ;;  %s959_s22 = scalar_lea.hbm %s1236_s11, 16 }
  0x21   : > { %570 = vmatpush.bf16.msra.mxu2 %v881_v18  ;;  %v888_v17 = vld [vmem:[%s1234_s9] sm:$0xff]  ;;  %p960_p0 = scmp.lt.s32.totalorder %s954_s1, %s1236_s11  ;;  %p961_p1 = scmp.lt.s32.totalorder %s959_s22, %s955_s2 }
  0x22   : > { %693 = vmatpush.bf16.msrb.mxu0 %v888_v17  ;;  %v933_v18 = vld [vmem:[%s1233_s8 + $0x1] ss:$0 sm:$0xff]  ;;  %p957_p12 = pnand %p956_p11, %p1102_p5 }
  0x23   : > { %653 = vmatpush.bf16.msra.mxu3 %v885_v57  ;;  %p962_p2 = por %p961_p1, %p960_p0 }
  0x24   : > { %p958_p13 = pneg %p957_p12 }
  0x25   : > { %571 = vmatpush.bf16.msra.mxu2 %v880_v34 }
  0x26   : > { %496 = vadd.xlane.f32.xlu0 %v495_v8  ;;  %p963_p3 = pnand %p962_p2, %p958_p13 }
  0x27   : > { %654 = vmatpush.bf16.msra.mxu3 %v884_v58 }
  0x91   : > { %v493_v25 = vpop.xlane.xlu0 %492 }
  0x92   : > { %v498_v26 = vmul.f32 0.03125, %v493_v25  ;;  %v934_v25 = vld [vmem:[%s1235_s10] ss:$0 sm:$0xff] }
  0x94   : > { %v500_v28 = vmul.f32 %v498_v26, %v498_v26  ;;  %v503_v40 = vsub.f32 %v490_v5, %v498_v26 }
  0x99   : > { %v497_v27 = vpop.xlane.xlu0 %496 }
  0x9a   : > { %v499_v29 = vmul.f32 0.03125, %v497_v27 }
  0x9b   : > { %v444_v10 = vpop.f32.mrf.mxu0 }
  0x9c   : > { %v445_v11 = vadd.f32 %v930_v9, %v444_v10  ;;  %v501_v30 = vsub.f32 %v499_v29, %v500_v28 }
  0x9e   : > { %v448_v12 = vmul.f32 0.2, %v445_v11  ;;  %v502_v31 = vmax.f32 %v501_v30, 0.0 }
  0xa0   : > { %v449_v13 = vmax.f32 %v445_v11, %v448_v12  ;;  %v504_v32 = vadd.f32 1e-06, %v502_v31 }
  0xa2   : > { %v454_v14 = vpack.c.bf16 %v449_v13, %v449_v13  ;;  %935 = vrsqrt.f32 %v504_v32  ;;  %vm511_vm2 = vweird.f32 %v504_v32 }
  0xa3   : > { %v446_v15 = vpop.f32.mrf.mxu0 }
  0xa4   : > { %820 = vmatmul.msk.bf16.vlgmr.msra.gmra.mxu1 %vm471_vm1, %v454_v14 }
  0xa8   : > { %v936_v33 = vpop.eup %935 }
  0xa9   : > { %v506_v35 = vmul.f32 %v936_v33, %v504_v32  ;;  %vm512_vm3 = vweird.f32 %v936_v33 }
  0xaa   : > { %vm513_vm4 = vmor %vm511_vm2, %vm512_vm3 }
  0xab   : > { %v507_v36 = vmul.f32 %v936_v33, %v506_v35 }
  0xad   : > { %v508_v37 = vmul.f32 0.5, %v507_v36 }
  0xaf   : > { %v509_v38 = vsub.f32 1.5, %v508_v37 }
  0xb1   : > { %v510_v39 = vmul.f32 %v936_v33, %v509_v38 }
  0xb3   : > { %v514_v41 = vsel %vm513_vm4, %v936_v33, %v510_v39 }
  0xb4   : > { %v515_v42 = vmul.f32 %v514_v41, %v503_v40 }
  0xb6   : > { %v516_v43 = vmul.f32 0.2, %v515_v42 }
  0xb8   : > { %v517_v44 = vmax.f32 %v515_v42, %v516_v43 }
 0x121   : > { %v484_v20 = vpop.f32.mrf.mxu1 }
 0x122   : > { %v485_v22 = vadd.f32 %v931_v19, %v484_v20 }
 0x124   : > { %v489_v23 = vadd.f32 %v488_v21, %v485_v22 }
 0x126   : > { %519 = vrot.lane.b32.xlu1 %v489_v23, %s1003_s24 }
 0x129   : > { %v486_v24 = vpop.f32.mrf.mxu1 }
 0x198   : > { %v520_v45 = vpop.permute.xlu1 %519 }
 0x199   : > { %v522_v46 = vsel %vm471_vm1, %v517_v44, %v520_v45 }
 0x19a   : > { %v531_v47 = vpack.c.bf16 %v522_v46, %v522_v46 }
 0x19c   : > { %837 = vmatmul.msk.bf16.vlgmr.msra.gmra.mxu2 %vm560_vm5, %v531_v47 }
 0x21f   : > { %v573_v49 = vpop.f32.mrf.mxu2 }
 0x220   : > { %v574_v50 = vadd.f32 %v932_v48, %v573_v49 }
 0x222   : > { %v577_v51 = vsel %vm471_vm1, %v574_v50, 0.0  ;;  %v580_v52 = vmul.f32 %v574_v50, %v574_v50 }
 0x223   : > { %578 = vadd.xlane.f32.xlu1 %v577_v51 }
 0x224   : > { %v581_v53 = vsel %vm471_vm1, %v580_v52, 0.0 }
 0x225   : > { %582 = vadd.xlane.f32.xlu2 %v581_v53 }
 0x227   : > { %v575_v54 = vpop.f32.mrf.mxu2 }
 0x296   : > { %v579_v59 = vpop.xlane.xlu1 %578 }
 0x297   : > { %v584_v60 = vmul.f32 0.03125, %v579_v59 }
 0x298   : > { %v583_v61 = vpop.xlane.xlu2 %582 }
 0x299   : > { %v586_v62 = vmul.f32 %v584_v60, %v584_v60  ;;  %v585_v63 = vmul.f32 0.03125, %v583_v61  ;;  %v589_v10 = vsub.f32 %v574_v50, %v584_v60 }
 0x29b   : > { %v587_v0 = vsub.f32 %v585_v63, %v586_v62 }
 0x29d   : > { %v588_v2 = vmax.f32 %v587_v0, 0.0 }
 0x29f   : > { %v590_v3 = vadd.f32 1e-06, %v588_v2 }
 0x2a1   : > { %937 = vrsqrt.f32 %v590_v3  ;;  %vm597_vm7 = vweird.f32 %v590_v3 }
 0x2a7   : > { %v938_v4 = vpop.eup %937 }
 0x2a8   : > { %v592_v5 = vmul.f32 %v938_v4, %v590_v3  ;;  %vm598_vm6 = vweird.f32 %v938_v4 }
 0x2a9   : > { %vm599_vm8 = vmor %vm597_vm7, %vm598_vm6 }
 0x2aa   : > { %v593_v6 = vmul.f32 %v938_v4, %v592_v5 }
 0x2ac   : > { %v594_v7 = vmul.f32 0.5, %v593_v6 }
 0x2ae   : > { %v595_v8 = vsub.f32 1.5, %v594_v7 }
 0x2b0   : > { %v596_v9 = vmul.f32 %v938_v4, %v595_v8 }
 0x2b2   : > { %v600_v11 = vsel %vm599_vm8, %v938_v4, %v596_v9 }
 0x2b3   : > { %v601_v12 = vmul.f32 %v600_v11, %v589_v10 }
 0x2b5   : > { %v602_v13 = vmul.f32 0.2, %v601_v12 }
 0x2b7   : > { %v603_v14 = vmax.f32 %v601_v12, %v602_v13 }
 0x2b9   : > { %v604_v15 = vsel %vm471_vm1, %v603_v14, %v520_v45 }
 0x2ba   : > { %v614_v16 = vpack.c.bf16 %v604_v15, %v604_v15 }
 0x2bc   : > { %863 = vmatmul.msk.bf16.vlgmr.msra.gmra.mxu3 %vm560_vm5, %v614_v16 }
 0x33f   : > { %v656_v19 = vpop.f32.mrf.mxu3 }
 0x340   : > { %v657_v20 = vadd.f32 %v933_v18, %v656_v19 }
 0x342   : > { %v660_v21 = vmul.f32 0.2, %v657_v20 }
 0x344   : > { %v661_v22 = vmax.f32 %v657_v20, %v660_v21 }
 0x346   : > { %v666_v23 = vpack.c.bf16 %v661_v22, %v661_v22 }
 0x347   : > { %v658_v24 = vpop.f32.mrf.mxu3 }
 0x348   : > { %872 = vmatmul.msk.bf16.vlgmr.msrb.gmra.mxu0 %vm471_vm1, %v666_v23 }
 0x3c5   : > { %v695_v26 = vpop.f32.mrf.mxu0 }
 0x3c6   : > { %v696_v27 = vadd.f32 %v934_v25, %v695_v26 }
 0x3c8   : > { %699 = vst.msk [vmem:[%s403_s30] sm:$0xff] %vm471_vm1, %v696_v27 }
 0x3c9   : > { %966 = shalt.err (!%p963_p3)
}
 0x3ca   : > { %890 = dma.vmem_to_hbm [thread:$0]  (%p1102_p5), %s714_s12, 128, %s716_s14, %s701_s21  }
 0x3cd   : > { %v697_v28 = vpop.f32.mrf.mxu0 }
 0x3ce PF: > { %p896_p4 = scmp.ge.s32.totalorder %s1001_s20, 2  ;;  %s727_s15 = sand.u32 1, %s989_s17  }
 0x3cf   : > { %s728_s13 = scalar_lea.sflag [#allocation3], %s727_s15 }
 0x3d0   : > { %p893_p7 = pnand %p896_p4, %p1106_p6 }
 0x3d2   : > { %p894_p8 = pneg %p893_p7 }
 0x3d4   : > { %984 = dma.done.wait (%p894_p8), %s728_s13, 128  }
 0x3d5   : > { %986 = vsyncadd (%p894_p8), %s728_s13, 4294967168  ;;  %p21_p9 = scmp.ge.s32.totalorder %s1089_s23, 4   ;;  %s1245_s17 = smov %s993_s18 }
 0x3d6   : > { %s1246_s18 = smov %s997_s19  ;;  %s1247_s19 = smov %s1100_s26 }
 0x3d7   : > { %s1248_s20 = smov %s1089_s23  ;;  %23 = sbr.rel (!%p21_p9) target bundleno = 7 (0x7), region = 107 }
 0x3dc   :  { %734 = vsyncpa [#allocation3], 1 }
 0x3dd   :  { %736 = vsyncpa [#allocation3 + $0x1], 1 }

</bundles_post_ra>
